<compile_context>
chip_gen: v7x
topology: tpu7x:2x2x1
jax: 0.10.0
libtpu: 0.0.40
codegen_flags: <defaults>
</compile_context>

<pallas_src>
import math

import jax
import jax.numpy as jnp
from jax.experimental import pallas as pl
from jax.experimental.pallas import tpu as pltpu

_LANE = 128
_MIN_PALLAS_ELEMS = 1 << 20            # below ~1M elems a 1-2 step Pallas call can't beat XLA's fused add
_TILE_TARGET_BYTES = 4 * 1024 * 1024   # per-step x-tile byte target (>=1-2 MiB hits ~85-90% of roofline)


def _build_pe(d_model: int, max_seq_length: int, dtype=jnp.float32) -> jnp.ndarray:
    """Deterministic positional-encoding table, identical to the PyTorch init.

    Build it in the model dtype at init so the forward pass never pays a per-call cast.
    """
    position = jnp.arange(max_seq_length, dtype=jnp.float32)[:, None]              # (L, 1)
    div_term = jnp.exp(
        jnp.arange(0, d_model, 2, dtype=jnp.float32) * (-math.log(10000.0) / d_model)
    )                                                                               # (ceil(D/2),)
    ang = position * div_term                                                       # (L, ceil(D/2))
    pe = jnp.zeros((max_seq_length, d_model), jnp.float32)
    pe = pe.at[:, 0::2].set(jnp.sin(ang))
    pe = pe.at[:, 1::2].set(jnp.cos(ang[:, : d_model // 2]))                        # safe for odd d_model
    return pe.astype(dtype)


def _vmem_budgets():
    """(vmem_limit_bytes, tile_budget_bytes) derived from the hardware generation."""
    cap = 64 * 1024 * 1024
    try:
        info = pltpu.get_tpu_info()
        cap = getattr(info, "vmem_capacity_bytes", cap) or cap
    except Exception:
        pass
    if cap >= 100 * 1024 * 1024:
        # v5e / v6e: 128 MiB physical VMEM -> be generous.
        return 96 * 1024 * 1024, 72 * 1024 * 1024
    # v7x: 64 MiB physical per TensorCore -> leave headroom for internal scratch.
    return 48 * 1024 * 1024, 36 * 1024 * 1024


def _add_pe_kernel(x_ref, pe_ref, o_ref):
    # x_ref / o_ref: (TB, TR, C) tile; pe_ref: (TR, C), broadcast over the batch block dim.
    o_ref[...] = x_ref[...] + pe_ref[...]


def _tiled_add_pe(x, pe, *, max_rows_per_tile=None, alias_input=False):
    """x: (B, R, C); pe: (Lp, C) with Lp >= R, same dtype.  Returns x + pe[:R][None]."""
    B, R, C = x.shape
    Lp = pe.shape[0]
    itemsize = jnp.dtype(x.dtype).itemsize
    # Sublane granularity for the second-to-last block dim: 8 (f32), 16 (bf16), 32 (8-bit).
    sub = 8 * max(4 // itemsize, 1)

    vmem_limit, tile_budget = _vmem_budgets()

    # Per-step x-tile byte target, capped so 2 buffers x (x tile + pe tile + out tile) fits
    # the budget; never smaller than one minimal (sub, C) row group.
    per_tile_bytes = min(_TILE_TARGET_BYTES, max(tile_budget // 6, sub * C * itemsize))

    cap_rows = max(per_tile_bytes // (C * itemsize), sub)
    if max_rows_per_tile is not None:
        cap_rows = min(cap_rows, max_rows_per_tile)

    if cap_rows >= R:
        tr = R                                   # full row extent: always legal for x
        if R % sub != 0 and Lp != R:
            pe = pe[:R]                          # make the pe block full-extent too (legality)
            Lp = R
    else:
        tr = 0
        t = (cap_rows // sub) * sub
        while t >= sub:                          # prefer a tile that divides R (no ragged last block)
            if R % t == 0:
                tr = t
                break
            t -= sub
        if tr == 0:                              # ragged last block: Pallas pads reads / masks writes
            tr = max((cap_rows // sub) * sub, sub)
    n_r = pl.cdiv(R, tr)

    # Batch blocking: single row tile but still far below the byte target -> block batches.
    tb = 1
    if n_r == 1 and B > 1:
        tile_bytes = tr * C * itemsize
        if tile_bytes < per_tile_bytes:
            tb = int(min(B, max(per_tile_bytes // max(tile_bytes, 1), 1)))
    n_b = pl.cdiv(B, tb)

    grid = (n_r, n_b)
    # Multiple row tiles: row axis parallel (megacore work), batch axis arbitrary so the
    # pe block index stays constant along consecutive steps and pe is not re-streamed B times.
    # Single row tile: the pe index is globally constant, so sharding the batch axis is safe
    # and keeps both v7x TensorCores streaming.
    dims = ("parallel", "arbitrary") if n_r > 1 else ("arbitrary", "parallel")

    pe_rows_read = min(Lp, n_r * tr)
    cost = pl.CostEstimate(
        flops=B * R * C,
        transcendentals=0,
        bytes_accessed=(2 * B * R * C + pe_rows_read * C) * itemsize,
    )

    return pl.pallas_call(
        _add_pe_kernel,
        out_shape=jax.ShapeDtypeStruct((B, R, C), x.dtype),
        grid_spec=pltpu.PrefetchScalarGridSpec(
            num_scalar_prefetch=0,
            grid=grid,
            in_specs=[
                pl.BlockSpec((tb, tr, C), lambda r, b: (b, r, 0)),
                pl.BlockSpec((tr, C), lambda r, b: (r, 0)),
            ],
            out_specs=pl.BlockSpec((tb, tr, C), lambda r, b: (b, r, 0)),
        ),
        compiler_params=pltpu.CompilerParams(
            dimension_semantics=dims,
            vmem_limit_bytes=vmem_limit,
        ),
        cost_estimate=cost,
        # Only beneficial when x is actually donated at the surrounding jit; otherwise XLA
        # inserts a defensive full copy -> default off.
        input_output_aliases=({0: 0} if alias_input else {}),
    )(x, pe)


def positional_encoding_forward(x, pe, *, force_pallas=False, max_rows_per_tile=None,
                                alias_input=False):
    """x: (B, S, D); pe: (max_seq_length, D).  Returns x + pe[:S][None]."""
    B, S, D = x.shape

    if not force_pallas and B * S * D < _MIN_PALLAS_ELEMS:
        # Small inputs: pallas_call fixed overhead dwarfs the copy; let XLA fuse the add.
        return x + pe[:S].astype(x.dtype)[None, :, :]

    if D % _LANE == 0:
        # d_model already lane-dense: pass the FULL pe table; the index_map only touches the
        # first cdiv(S, tr) row tiles, so no per-call pe[:S] slice pass over HBM is needed.
        pe_arg = pe
        if pe.dtype != x.dtype:
            # Prefer building pe in the model dtype at init; this cast only runs on mismatch.
            pe_arg = pe[:S].astype(x.dtype)
        return _tiled_add_pe(x, pe_arg, max_rows_per_tile=max_rows_per_tile,
                             alias_input=alias_input)

    if (S * D) % _LANE == 0:
        # Collapse (S, D) into 128-wide lane-dense rows so stores are unmasked full-lane vst.
        R = (S * D) // _LANE
        pe_rows = pe[:S].astype(x.dtype).reshape(R, _LANE)
        out = _tiled_add_pe(x.reshape(B, R, _LANE), pe_rows,
                            max_rows_per_tile=max_rows_per_tile, alias_input=alias_input)
        return out.reshape(B, S, D)

    # D not lane-dense and (S*D) % 128 != 0: a Pallas path would need sub-128-lane masked
    # stores (~4.5x slower); XLA's fused add already hits roofline for this trivial op.
    return x + pe[:S].astype(x.dtype)[None, :, :]


if __name__ == "__main__":
    # 1) Small shapes consistent with the module: batch=2, seq=8, d_model=32, max_seq_length=16.
    B, S, D = 2, 8, 32
    max_seq_length = 16

    key = jax.random.PRNGKey(0)
    x = jax.random.normal(key, (B, S, D), dtype=jnp.float32)
    pe = _build_pe(D, max_seq_length)
    expected = x + pe[:S][None, :, :]

    # Default path: tiny input handled by the plain-JAX fast path.
    out_auto = jax.block_until_ready(positional_encoding_forward(x, pe))
    # Force the Pallas kernel (lane-dense reshape path: D=32 -> (B, S*D/128, 128) blocks,
    # batch blocking folds both batch elements into one step).
    out_pallas = jax.block_until_ready(positional_encoding_forward(x, pe, force_pallas=True))

    # 2) Tiled multi-row-tile path: D multiple of 128, pe table longer than S (full-pe pass),
    #    several row tiles so pe stays resident across the inner batch axis.
    B2, S2, D2 = 2, 64, 128
    x2 = jax.random.normal(jax.random.PRNGKey(1), (B2, S2, D2), dtype=jnp.float32)
    pe2 = _build_pe(D2, 128)
    expected2 = x2 + pe2[:S2][None, :, :]
    out_tiled = jax.block_until_ready(
        positional_encoding_forward(x2, pe2, force_pallas=True, max_rows_per_tile=16))

    # 3) Batch-blocking path: small S, single row tile, several batch elements per step.
    B3, S3, D3 = 8, 16, 128
    x3 = jax.random.normal(jax.random.PRNGKey(2), (B3, S3, D3), dtype=jnp.float32)
    pe3 = _build_pe(D3, S3)
    expected3 = x3 + pe3[:S3][None, :, :]
    out_batched = jax.block_until_ready(
        positional_encoding_forward(x3, pe3, force_pallas=True))

    # 4) bf16 model dtype, S not a sublane multiple, pe table longer than S
    #    (exercises the full-extent-pe legality slice and no per-call cast).
    B4, S4, D4 = 2, 24, 128
    x4 = jax.random.normal(jax.random.PRNGKey(3), (B4, S4, D4), dtype=jnp.bfloat16)
    pe4 = _build_pe(D4, 32, dtype=jnp.bfloat16)
    expected4 = x4 + pe4[:S4][None, :, :]
    out_bf16 = jax.block_until_ready(
        positional_encoding_forward(x4, pe4, force_pallas=True))

    assert out_auto.shape == (B, S, D)
    assert out_pallas.shape == (B, S, D)
    assert out_tiled.shape == (B2, S2, D2)
    assert out_batched.shape == (B3, S3, D3)
    assert out_bf16.shape == (B4, S4, D4)
    assert jnp.allclose(out_auto, expected, atol=1e-6, rtol=1e-6)
    assert jnp.allclose(out_pallas, expected, atol=1e-6, rtol=1e-6)
    assert jnp.allclose(out_tiled, expected2, atol=1e-5, rtol=1e-5)
    assert jnp.allclose(out_batched, expected3, atol=1e-5, rtol=1e-5)
    assert jnp.allclose(out_bf16.astype(jnp.float32), expected4.astype(jnp.float32),
                        atol=1e-2, rtol=1e-2)

    print("KERNEL_OK")
</pallas_src>

<mosaic_0001>
module attributes {stable_mosaic.version = 11 : i64} {
  func.func @_add_pe_kernel(%arg0: i32, %arg1: i32, %arg2: memref<2x2x128xf32, #tpu.memory_space<vmem>>, %arg3: memref<2x128xf32, #tpu.memory_space<vmem>>, %arg4: memref<2x2x128xf32, #tpu.memory_space<vmem>>) attributes {dimension_semantics = [#tpu.dimension_semantics<arbitrary>, #tpu.dimension_semantics<parallel>], iteration_bounds = array<i64: 1, 1>, scalar_prefetch = 0 : i64, scratch_operands = 0 : i64, tpu.core_type = #tpu.core_type<tc>, window_params = [{transform_indices = @transform_0, window_bounds = array<i64: 2, 2, 128>}, {transform_indices = @transform_1, window_bounds = array<i64: 2, 128>}, {transform_indices = @transform_2, window_bounds = array<i64: 2, 2, 128>}]} {
    %c0 = arith.constant 0 : index
    %c0_0 = arith.constant 0 : index
    %c0_1 = arith.constant 0 : index
    %0 = vector.load %arg2[%c0, %c0_0, %c0_1] : memref<2x2x128xf32, #tpu.memory_space<vmem>>, vector<2x2x128xf32>
    %c0_2 = arith.constant 0 : index
    %c0_3 = arith.constant 0 : index
    %1 = vector.load %arg3[%c0_2, %c0_3] : memref<2x128xf32, #tpu.memory_space<vmem>>, vector<2x128xf32>
    %2 = vector.shape_cast %1 : vector<2x128xf32> to vector<1x2x128xf32>
    %3 = vector.broadcast %2 : vector<1x2x128xf32> to vector<2x2x128xf32>
    %4 = arith.addf %0, %3 : vector<2x2x128xf32>
    %c0_4 = arith.constant 0 : index
    %c0_5 = arith.constant 0 : index
    %c0_6 = arith.constant 0 : index
    %5 = vector.load %arg4[%c0_4, %c0_5, %c0_6] : memref<2x2x128xf32, #tpu.memory_space<vmem>>, vector<2x2x128xf32>
    tpu.vector_store %arg4[%c0_4, %c0_5, %c0_6], %4 {strides = array<i32>} : memref<2x2x128xf32, #tpu.memory_space<vmem>>, vector<2x2x128xf32>,
    return
  }
  func.func @transform_0(%arg0: i32, %arg1: i32) -> (i32, i32, i32) {
    %c0_i32 = arith.constant 0 : i32
    %c0_i32_0 = arith.constant 0 : i32
    return %arg1, %arg0, %c0_i32 : i32, i32, i32
  }
  func.func @transform_1(%arg0: i32, %arg1: i32) -> (i32, i32) {
    %c0_i32 = arith.constant 0 : i32
    %c0_i32_0 = arith.constant 0 : i32
    return %arg0, %c0_i32 : i32, i32
  }
  func.func @transform_2(%arg0: i32, %arg1: i32) -> (i32, i32, i32) {
    %c0_i32 = arith.constant 0 : i32
    %c0_i32_0 = arith.constant 0 : i32
    return %arg1, %arg0, %c0_i32 : i32, i32, i32
  }
}

</mosaic_0001>

<bundles_post_ra>
// kernel: tpu_custom_call.1
= control target key start
LH: loop header
LB: loop body
LE: loop exit
PB: predicated region body
PF: predicated region fallthrough
CT: control target
= control target key end

     0   :  { %7 = vsyncpa [#allocation3], 0  ;;  %s154_s0 = inlined_call_operand.hbm [shape: f32[2,2,128], index: 0, kind: input, shape index: {}]   ;;  %s155_s1 = inlined_call_operand.vmem [shape: f32[2,128], index: 1, kind: input, shape index: {}]   ;;  %s156_s2 = inlined_call_operand.hbm [shape: f32[2,2,128], index: 2, kind: output, shape index: {}]  }
   0x1   :  { %8 = vsyncpa [#allocation4], 0  ;;  %s102_s9 = smov [#allocation2]   ;;  %s54_s13 = scalar_lea.hbm %s154_s0, 64 }
   0x2   :  { %s14_s10 = sshll.u32 %s102_s9, 4  ;;  %p55_p0 = scmp.ne.s32.totalorder %s154_s0, %s54_s13  ;;  %s15_s10 = int_to_ptr.vmem [resolvable:$true] %s14_s10 }
   0x3   :  { %p58_p1 = scmp.lt.u32.totalorder %s54_s13, %s154_s0 }
   0x5   :  { %p60_p2 = pnand %p58_p1, %p55_p0 }
   0x7   :  { %63 = shalt.err (!%p60_p2)
}
   0x8   :  { %s64_s18 = scalar_lea.vmem %s15_s10, 64  ;;  %p69_p4 = scmp.lt.s32.totalorder %s15_s10, %s15_s10 }
   0x9   :  { %p65_p3 = scmp.ne.s32.totalorder %s15_s10, %s64_s18  ;;  %p70_p5 = scmp.lt.s32.totalorder %s64_s18, %s64_s18 }
   0xb   :  { %p71_p6 = por %p70_p5, %p69_p4 }
   0xd   :  { %p72_p7 = pnand %p71_p6, %p65_p3 }
   0xf   :  { %75 = shalt.err (!%p72_p7)
}
  0x10   :  { %s103_s19 = smov 32   ;;  %s104_s20 = smov 2  }
  0x11   :  { %20 = dma.hbm_to_vmem [thread:$0]  %s154_s0, 64, %s15_s10, [#allocation3], %s103_s19, %s103_s19, %s104_s20  }
  0x12   :  { %98 = dma.done.wait [#allocation3], 64  }
  0x13   :  { %99 = vsyncadd [#allocation3], 4294967232  ;;  %s105_s23 = smov [#allocation5]   ;;  %v26_v0 = vld [vmem:[#allocation2] sm:$0x3] }
  0x14   :  { %s38_s24 = sshll.u32 %s105_s23, 4  ;;  %v28_v1 = vld [vmem:[%s155_s1] sm:$0x3]  ;;  %v27_v2 = vld [vmem:[#allocation2 + $0x2] sm:$0x3]  ;;  %s39_s24 = int_to_ptr.vmem [resolvable:$true] %s38_s24 }
  0x15   :  { %v29_v3 = vadd.f32 %v28_v1, %v26_v0  ;;  %v30_v4 = vadd.f32 %v28_v1, %v27_v2  ;;  %s76_s27 = scalar_lea.vmem %s39_s24, 64  ;;  %p81_p9 = scmp.lt.s32.totalorder %s39_s24, %s39_s24 }
  0x16   :  { %p77_p8 = scmp.ne.s32.totalorder %s39_s24, %s76_s27  ;;  %p82_p10 = scmp.lt.s32.totalorder %s76_s27, %s76_s27 }
  0x17   :  { %31 = vst [vmem:[#allocation5] sm:$0x3] %v29_v3  ;;  %32 = vst [vmem:[#allocation5 + $0x2] sm:$0x3] %v30_v4 }
  0x18   :  { %p83_p11 = por %p82_p10, %p81_p9 }
  0x1a   :  { %p84_p12 = pnand %p83_p11, %p77_p8 }
  0x1c   :  { %87 = shalt.err (!%p84_p12)
}
  0x1d   :  { %s88_s29 = scalar_lea.hbm %s156_s2, 64 }
  0x1e   :  { %p89_p13 = scmp.ne.s32.totalorder %s156_s2, %s88_s29  ;;  %p92_p0 = scmp.lt.u32.totalorder %s88_s29, %s156_s2 }
  0x20   :  { %p94_p1 = pnand %p92_p0, %p89_p13 }
  0x22   :  { %97 = shalt.err (!%p94_p1)
}
  0x23   :  { %44 = dma.vmem_to_hbm [thread:$0]  %s39_s24, 64, %s156_s2, [#allocation4], %s103_s19, %s103_s19, %s104_s20  }
  0x24   :  { %100 = dma.done.wait [#allocation4], 64  }
  0x25   :  { %101 = vsyncadd [#allocation4], 4294967232 }
  0x26   :  { %48 = vsyncpa [#allocation3], 1 }
  0x27   :  { %49 = vsyncpa [#allocation4], 1 }

</bundles_post_ra>
